<compile_context>
chip_gen: v7x
topology: tpu7x:2x2x1
jax: 0.10.0
libtpu: 0.0.40
codegen_flags: <defaults>
</compile_context>

<pallas_src>
import jax
import jax.numpy as jnp
from jax.experimental import pallas as pl
from jax.experimental.pallas import tpu as pltpu
import numpy as np


def _round_up(a, m):
    return (a + m - 1) // m * m


def make_lstm1_kernel(meta):
    I, H, F1, C = meta["I"], meta["H"], meta["F1"], meta["C"]
    Ipad, vec = meta["Ipad"], meta["vec"]
    G = 4 * H

    def kernel(x_ref, w_ref, o_ref):
        # x_ref: (B, T, I) batch-first, exactly as PyTorch hands it over.
        B, T, _ = x_ref.shape

        # Static ref slices into the single packed weight slab (zero-cost views,
        # loaded as aligned sub-windows).
        wih = w_ref[0:I, 0:G]                         # (I, 4H)
        whh = w_ref[Ipad:Ipad + H, 0:G]               # (H, 4H)
        w1 = w_ref[Ipad + H:Ipad + 2 * H, 0:F1]       # (H, 128)
        bg = w_ref[vec + 0:vec + 1, 0:G]              # (1, 4H)  b_ih + b_hh
        b1 = w_ref[vec + 1:vec + 2, 0:F1]             # (1, 128)
        w2r = w_ref[vec + 2:vec + 3, 0:F1]            # (1, 128) fc weight row (C == 1)
        b2 = w_ref[vec + 3:vec + 4, 0:1]              # (1, 1)

        # Hoisted input projection: every timestep's x @ W_ih^T + b is computed up
        # front (independent of h), keeping only h @ W_hh on the serial chain.
        gxb = [jnp.dot(x_ref[bi], wih, preferred_element_type=jnp.float32) + bg
               for bi in range(B)]                    # B x (T, 4H)

        h = jnp.zeros((B, H), jnp.float32)
        c = jnp.zeros((B, H), jnp.float32)

        # Fully unrolled recurrence (T static and small).
        for t in range(T):
            # Gather this timestep's precomputed input gates for the whole batch
            # (off the critical path: depends only on gxb).
            g_x = jnp.concatenate(
                [gxb[bi][t:t + 1, :] for bi in range(B)], axis=0)        # (B, 4H)
            gates = g_x + jnp.dot(h, whh, preferred_element_type=jnp.float32)

            # Full-width nonlinearities (one sigmoid + one tanh per step), then
            # cheap lane slices for the individual gates.  PyTorch order [i,f,g,o].
            sig = jax.nn.sigmoid(gates)
            th = jnp.tanh(gates)
            i_g = sig[:, 0 * H:1 * H]
            f_g = sig[:, 1 * H:2 * H]
            g_g = th[:, 2 * H:3 * H]
            o_g = sig[:, 3 * H:4 * H]

            c = f_g * c + i_g * g_g
            h = o_g * jnp.tanh(c)

        # Fused head: fc( relu( fc_1( relu(h_T) ) ) )
        hn = jnp.maximum(h, 0.0)
        z1 = jnp.maximum(
            jnp.dot(hn, w1, preferred_element_type=jnp.float32) + b1, 0.0)
        # num_classes == 1: VPU multiply + lane reduction instead of an N=1 MXU
        # matmul (saves a final MXU push + drain in the epilogue).
        o_ref[...] = jnp.sum(z1 * w2r, axis=-1, keepdims=True) + b2

    return kernel


def pack_params(raw):
    """One-time packing of all weights/biases into a single lane-padded slab.

    Done at init time with numpy, so the forward path sees exactly two inputs
    (x and the slab) and two DMAs instead of nine.
    """
    w_ih, w_hh, b_ih, b_hh, w1, b1, w2, b2 = [np.asarray(a, np.float32) for a in raw]
    I = w_ih.shape[1]
    H = w_hh.shape[1]
    F1 = w1.shape[0]
    C = w2.shape[0]
    assert C == 1, "packed fc tail assumes num_classes == 1 (module spec)"
    G = 4 * H

    lanes = max(_round_up(G, 128), _round_up(F1, 128))
    Ipad = _round_up(max(I, 1), 8)
    vec = Ipad + 2 * H
    rows = vec + 8

    slab = np.zeros((rows, lanes), np.float32)
    slab[0:I, :G] = w_ih.T                       # (I, 4H)
    slab[Ipad:Ipad + H, :G] = w_hh.T             # (H, 4H)
    slab[Ipad + H:Ipad + 2 * H, :F1] = w1.T      # (H, 128)
    slab[vec + 0, :G] = b_ih + b_hh              # summed LSTM bias
    slab[vec + 1, :F1] = b1
    slab[vec + 2, :F1] = w2[0]                   # fc weight as a lane row
    slab[vec + 3, 0] = b2[0]

    meta = dict(I=I, H=H, F1=F1, C=C, Ipad=Ipad, vec=vec)
    return jnp.asarray(slab), meta


def lstm1_forward(x, packed_slab, meta):
    """x: (B, T, I) float32 (PyTorch batch_first layout). No wrapper-side XLA ops."""
    B, T, I = x.shape
    vmem = pl.BlockSpec(memory_space=pltpu.MemorySpace.VMEM)
    return pl.pallas_call(
        make_lstm1_kernel(meta),
        out_shape=jax.ShapeDtypeStruct((B, meta["C"]), jnp.float32),
        in_specs=[vmem, vmem],
        out_specs=vmem,
    )(x, packed_slab)


def lstm1_reference(x, raw):
    """Pure-JAX reference of the same forward pass (for validation)."""
    w_ih, w_hh, b_ih, b_hh, w1, b1, w2, b2 = [jnp.asarray(a) for a in raw]
    B, T, I = x.shape
    H = w_hh.shape[1]
    h0 = jnp.zeros((B, H), jnp.float32)
    c0 = jnp.zeros((B, H), jnp.float32)

    def step(carry, x_t):
        h, c = carry
        gates = x_t @ w_ih.T + h @ w_hh.T + b_ih + b_hh
        i_g = jax.nn.sigmoid(gates[:, 0 * H:1 * H])
        f_g = jax.nn.sigmoid(gates[:, 1 * H:2 * H])
        g_g = jnp.tanh(gates[:, 2 * H:3 * H])
        o_g = jax.nn.sigmoid(gates[:, 3 * H:4 * H])
        c_new = f_g * c + i_g * g_g
        h_new = o_g * jnp.tanh(c_new)
        return (h_new, c_new), None

    (hn, _), _ = jax.lax.scan(step, (h0, c0), jnp.swapaxes(x, 0, 1))
    out = jnp.maximum(hn, 0.0)
    out = jnp.maximum(out @ w1.T + b1, 0.0)
    return out @ w2.T + b2


def init_raw_params(key, input_size, hidden_size, fc1_size, num_classes):
    """Deterministic init mirroring PyTorch shapes (uniform ±1/sqrt(fan))."""
    ks = jax.random.split(key, 8)
    H, I, F1, C = hidden_size, input_size, fc1_size, num_classes
    s_lstm = 1.0 / np.sqrt(H)
    s_fc1 = 1.0 / np.sqrt(H)
    s_fc2 = 1.0 / np.sqrt(F1)

    w_ih = jax.random.uniform(ks[0], (4 * H, I), jnp.float32, -s_lstm, s_lstm)
    w_hh = jax.random.uniform(ks[1], (4 * H, H), jnp.float32, -s_lstm, s_lstm)
    b_ih = jax.random.uniform(ks[2], (4 * H,), jnp.float32, -s_lstm, s_lstm)
    b_hh = jax.random.uniform(ks[3], (4 * H,), jnp.float32, -s_lstm, s_lstm)
    w1 = jax.random.uniform(ks[4], (F1, H), jnp.float32, -s_fc1, s_fc1)
    b1 = jax.random.uniform(ks[5], (F1,), jnp.float32, -s_fc1, s_fc1)
    w2 = jax.random.uniform(ks[6], (C, F1), jnp.float32, -s_fc2, s_fc2)
    b2 = jax.random.uniform(ks[7], (C,), jnp.float32, -s_fc2, s_fc2)
    return (w_ih, w_hh, b_ih, b_hh, w1, b1, w2, b2)


if __name__ == "__main__":
    # Small shapes consistent with the module's forward:
    #   batch=2, seq=8, input_size=4, hidden_size=32, num_layers=1, num_classes=1
    B, T, I, H, F1, C = 2, 8, 4, 32, 128, 1

    key = jax.random.PRNGKey(0)
    kx, kp = jax.random.split(key)
    x = jax.random.normal(kx, (B, T, I), jnp.float32)
    raw = init_raw_params(kp, I, H, F1, C)
    packed, meta = pack_params(raw)   # one-time, off the forward path

    out = jax.block_until_ready(lstm1_forward(x, packed, meta))
    ref = jax.block_until_ready(lstm1_reference(x, raw))
    np.testing.assert_allclose(np.asarray(out), np.asarray(ref), rtol=1e-5, atol=1e-5)

    print("KERNEL_OK")
</pallas_src>

<mosaic_0001>
module attributes {stable_mosaic.version = 11 : i64} {
  func.func @kernel(%arg0: memref<2x8x4xf32, #tpu.memory_space<vmem>>, %arg1: memref<80x128xf32, #tpu.memory_space<vmem>>, %arg2: memref<2x1xf32, #tpu.memory_space<vmem>>) attributes {dimension_semantics = [], scalar_prefetch = 0 : i64, scratch_operands = 0 : i64, tpu.core_type = #tpu.core_type<tc>} {
    %c0 = arith.constant 0 : index
    %c0_0 = arith.constant 0 : index
    %0 = vector.load %arg1[%c0, %c0_0] : memref<80x128xf32, #tpu.memory_space<vmem>>, vector<4x128xf32>
    %c8 = arith.constant 8 : index
    %c0_1 = arith.constant 0 : index
    %1 = vector.load %arg1[%c8, %c0_1] : memref<80x128xf32, #tpu.memory_space<vmem>>, vector<32x128xf32>
    %c40 = arith.constant 40 : index
    %c0_2 = arith.constant 0 : index
    %2 = vector.load %arg1[%c40, %c0_2] : memref<80x128xf32, #tpu.memory_space<vmem>>, vector<32x128xf32>
    %c72 = arith.constant 72 : index
    %c0_3 = arith.constant 0 : index
    %3 = vector.load %arg1[%c72, %c0_3] : memref<80x128xf32, #tpu.memory_space<vmem>>, vector<1x128xf32>
    %c73 = arith.constant 73 : index
    %c0_4 = arith.constant 0 : index
    %4 = vector.load %arg1[%c73, %c0_4] : memref<80x128xf32, #tpu.memory_space<vmem>>, vector<1x128xf32>
    %c74 = arith.constant 74 : index
    %c0_5 = arith.constant 0 : index
    %5 = vector.load %arg1[%c74, %c0_5] : memref<80x128xf32, #tpu.memory_space<vmem>>, vector<1x128xf32>
    %c75 = arith.constant 75 : index
    %c0_6 = arith.constant 0 : index
    %6 = vector.load %arg1[%c75, %c0_6] : memref<80x128xf32, #tpu.memory_space<vmem>>, vector<1x1xf32>
    %c0_7 = arith.constant 0 : index
    %c0_8 = arith.constant 0 : index
    %c0_9 = arith.constant 0 : index
    %7 = vector.load %arg0[%c0_7, %c0_8, %c0_9] : memref<2x8x4xf32, #tpu.memory_space<vmem>>, vector<1x8x4xf32>
    %8 = vector.shape_cast %7 : vector<1x8x4xf32> to vector<8x4xf32>
    %cst = arith.constant dense<0.000000e+00> : vector<8x128xf32>
    %9 = tpu.matmul %8, %0, %cst {dimension_numbers = #tpu.dot_dimension_numbers<[1], [0], [0], [1], [0, 0, 1, 1], [], []>} : vector<8x4xf32>, vector<4x128xf32>, vector<8x128xf32> -> vector<8x128xf32>
    %10 = vector.broadcast %3 : vector<1x128xf32> to vector<8x128xf32>
    %11 = arith.addf %9, %10 : vector<8x128xf32>
    %c1 = arith.constant 1 : index
    %c0_10 = arith.constant 0 : index
    %c0_11 = arith.constant 0 : index
    %12 = vector.load %arg0[%c1, %c0_10, %c0_11] : memref<2x8x4xf32, #tpu.memory_space<vmem>>, vector<1x8x4xf32>
    %13 = vector.shape_cast %12 : vector<1x8x4xf32> to vector<8x4xf32>
    %cst_12 = arith.constant dense<0.000000e+00> : vector<8x128xf32>
    %14 = tpu.matmul %13, %0, %cst_12 {dimension_numbers = #tpu.dot_dimension_numbers<[1], [0], [0], [1], [0, 0, 1, 1], [], []>} : vector<8x4xf32>, vector<4x128xf32>, vector<8x128xf32> -> vector<8x128xf32>
    %15 = vector.broadcast %3 : vector<1x128xf32> to vector<8x128xf32>
    %16 = arith.addf %14, %15 : vector<8x128xf32>
    %cst_13 = arith.constant 0.000000e+00 : f32
    %17 = vector.broadcast %cst_13 : f32 to vector<2x32xf32>
    %cst_14 = arith.constant 0.000000e+00 : f32
    %18 = vector.broadcast %cst_14 : f32 to vector<2x32xf32>
    %19 = vector.extract_strided_slice %11 {offsets = [0, 0], sizes = [1, 128], strides = [1, 1]} : vector<8x128xf32> to vector<1x128xf32>
    %20 = vector.extract_strided_slice %16 {offsets = [0, 0], sizes = [1, 128], strides = [1, 1]} : vector<8x128xf32> to vector<1x128xf32>
    %21 = tpu.concatenate %19, %20 in 0 : vector<1x128xf32>, vector<1x128xf32> -> vector<2x128xf32>
    %cst_15 = arith.constant dense<0.000000e+00> : vector<2x128xf32>
    %22 = tpu.matmul %17, %1, %cst_15 {dimension_numbers = #tpu.dot_dimension_numbers<[1], [0], [0], [1], [0, 0, 1, 1], [], []>} : vector<2x32xf32>, vector<32x128xf32>, vector<2x128xf32> -> vector<2x128xf32>
    %23 = arith.addf %21, %22 : vector<2x128xf32>
    %24 = arith.negf %23 : vector<2x128xf32>
    %25 = math.exp %24 : vector<2x128xf32>
    %cst_16 = arith.constant 1.000000e+00 : f32
    %26 = vector.broadcast %cst_16 : f32 to vector<2x128xf32>
    %27 = arith.addf %26, %25 : vector<2x128xf32>
    %28 = arith.divf %26, %27 : vector<2x128xf32>
    %29 = math.tanh %23 : vector<2x128xf32>
    %30 = vector.extract_strided_slice %28 {offsets = [0, 0], sizes = [2, 32], strides = [1, 1]} : vector<2x128xf32> to vector<2x32xf32>
    %31 = vector.extract_strided_slice %28 {offsets = [0, 32], sizes = [2, 32], strides = [1, 1]} : vector<2x128xf32> to vector<2x32xf32>
    %32 = vector.extract_strided_slice %29 {offsets = [0, 64], sizes = [2, 32], strides = [1, 1]} : vector<2x128xf32> to vector<2x32xf32>
    %33 = vector.extract_strided_slice %28 {offsets = [0, 96], sizes = [2, 32], strides = [1, 1]} : vector<2x128xf32> to vector<2x32xf32>
    %34 = arith.mulf %31, %18 : vector<2x32xf32>
    %35 = arith.mulf %30, %32 : vector<2x32xf32>
    %36 = arith.addf %34, %35 : vector<2x32xf32>
    %37 = math.tanh %36 : vector<2x32xf32>
    %38 = arith.mulf %33, %37 : vector<2x32xf32>
    %39 = vector.extract_strided_slice %11 {offsets = [1, 0], sizes = [1, 128], strides = [1, 1]} : vector<8x128xf32> to vector<1x128xf32>
    %40 = vector.extract_strided_slice %16 {offsets = [1, 0], sizes = [1, 128], strides = [1, 1]} : vector<8x128xf32> to vector<1x128xf32>
    %41 = tpu.concatenate %39, %40 in 0 : vector<1x128xf32>, vector<1x128xf32> -> vector<2x128xf32>
    %cst_17 = arith.constant dense<0.000000e+00> : vector<2x128xf32>
    %42 = tpu.matmul %38, %1, %cst_17 {dimension_numbers = #tpu.dot_dimension_numbers<[1], [0], [0], [1], [0, 0, 1, 1], [], []>} : vector<2x32xf32>, vector<32x128xf32>, vector<2x128xf32> -> vector<2x128xf32>
    %43 = arith.addf %41, %42 : vector<2x128xf32>
    %44 = arith.negf %43 : vector<2x128xf32>
    %45 = math.exp %44 : vector<2x128xf32>
    %cst_18 = arith.constant 1.000000e+00 : f32
    %46 = vector.broadcast %cst_18 : f32 to vector<2x128xf32>
    %47 = arith.addf %46, %45 : vector<2x128xf32>
    %48 = arith.divf %46, %47 : vector<2x128xf32>
    %49 = math.tanh %43 : vector<2x128xf32>
    %50 = vector.extract_strided_slice %48 {offsets = [0, 0], sizes = [2, 32], strides = [1, 1]} : vector<2x128xf32> to vector<2x32xf32>
    %51 = vector.extract_strided_slice %48 {offsets = [0, 32], sizes = [2, 32], strides = [1, 1]} : vector<2x128xf32> to vector<2x32xf32>
    %52 = vector.extract_strided_slice %49 {offsets = [0, 64], sizes = [2, 32], strides = [1, 1]} : vector<2x128xf32> to vector<2x32xf32>
    %53 = vector.extract_strided_slice %48 {offsets = [0, 96], sizes = [2, 32], strides = [1, 1]} : vector<2x128xf32> to vector<2x32xf32>
    %54 = arith.mulf %51, %36 : vector<2x32xf32>
    %55 = arith.mulf %50, %52 : vector<2x32xf32>
    %56 = arith.addf %54, %55 : vector<2x32xf32>
    %57 = math.tanh %56 : vector<2x32xf32>
    %58 = arith.mulf %53, %57 : vector<2x32xf32>
    %59 = vector.extract_strided_slice %11 {offsets = [2, 0], sizes = [1, 128], strides = [1, 1]} : vector<8x128xf32> to vector<1x128xf32>
    %60 = vector.extract_strided_slice %16 {offsets = [2, 0], sizes = [1, 128], strides = [1, 1]} : vector<8x128xf32> to vector<1x128xf32>
    %61 = tpu.concatenate %59, %60 in 0 : vector<1x128xf32>, vector<1x128xf32> -> vector<2x128xf32>
    %cst_19 = arith.constant dense<0.000000e+00> : vector<2x128xf32>
    %62 = tpu.matmul %58, %1, %cst_19 {dimension_numbers = #tpu.dot_dimension_numbers<[1], [0], [0], [1], [0, 0, 1, 1], [], []>} : vector<2x32xf32>, vector<32x128xf32>, vector<2x128xf32> -> vector<2x128xf32>
    %63 = arith.addf %61, %62 : vector<2x128xf32>
    %64 = arith.negf %63 : vector<2x128xf32>
    %65 = math.exp %64 : vector<2x128xf32>
    %cst_20 = arith.constant 1.000000e+00 : f32
    %66 = vector.broadcast %cst_20 : f32 to vector<2x128xf32>
    %67 = arith.addf %66, %65 : vector<2x128xf32>
    %68 = arith.divf %66, %67 : vector<2x128xf32>
    %69 = math.tanh %63 : vector<2x128xf32>
    %70 = vector.extract_strided_slice %68 {offsets = [0, 0], sizes = [2, 32], strides = [1, 1]} : vector<2x128xf32> to vector<2x32xf32>
    %71 = vector.extract_strided_slice %68 {offsets = [0, 32], sizes = [2, 32], strides = [1, 1]} : vector<2x128xf32> to vector<2x32xf32>
    %72 = vector.extract_strided_slice %69 {offsets = [0, 64], sizes = [2, 32], strides = [1, 1]} : vector<2x128xf32> to vector<2x32xf32>
    %73 = vector.extract_strided_slice %68 {offsets = [0, 96], sizes = [2, 32], strides = [1, 1]} : vector<2x128xf32> to vector<2x32xf32>
    %74 = arith.mulf %71, %56 : vector<2x32xf32>
    %75 = arith.mulf %70, %72 : vector<2x32xf32>
    %76 = arith.addf %74, %75 : vector<2x32xf32>
    %77 = math.tanh %76 : vector<2x32xf32>
    %78 = arith.mulf %73, %77 : vector<2x32xf32>
    %79 = vector.extract_strided_slice %11 {offsets = [3, 0], sizes = [1, 128], strides = [1, 1]} : vector<8x128xf32> to vector<1x128xf32>
    %80 = vector.extract_strided_slice %16 {offsets = [3, 0], sizes = [1, 128], strides = [1, 1]} : vector<8x128xf32> to vector<1x128xf32>
    %81 = tpu.concatenate %79, %80 in 0 : vector<1x128xf32>, vector<1x128xf32> -> vector<2x128xf32>
    %cst_21 = arith.constant dense<0.000000e+00> : vector<2x128xf32>
    %82 = tpu.matmul %78, %1, %cst_21 {dimension_numbers = #tpu.dot_dimension_numbers<[1], [0], [0], [1], [0, 0, 1, 1], [], []>} : vector<2x32xf32>, vector<32x128xf32>, vector<2x128xf32> -> vector<2x128xf32>
    %83 = arith.addf %81, %82 : vector<2x128xf32>
    %84 = arith.negf %83 : vector<2x128xf32>
    %85 = math.exp %84 : vector<2x128xf32>
    %cst_22 = arith.constant 1.000000e+00 : f32
    %86 = vector.broadcast %cst_22 : f32 to vector<2x128xf32>
    %87 = arith.addf %86, %85 : vector<2x128xf32>
    %88 = arith.divf %86, %87 : vector<2x128xf32>
    %89 = math.tanh %83 : vector<2x128xf32>
    %90 = vector.extract_strided_slice %88 {offsets = [0, 0], sizes = [2, 32], strides = [1, 1]} : vector<2x128xf32> to vector<2x32xf32>
    %91 = vector.extract_strided_slice %88 {offsets = [0, 32], sizes = [2, 32], strides = [1, 1]} : vector<2x128xf32> to vector<2x32xf32>
    %92 = vector.extract_strided_slice %89 {offsets = [0, 64], sizes = [2, 32], strides = [1, 1]} : vector<2x128xf32> to vector<2x32xf32>
    %93 = vector.extract_strided_slice %88 {offsets = [0, 96], sizes = [2, 32], strides = [1, 1]} : vector<2x128xf32> to vector<2x32xf32>
    %94 = arith.mulf %91, %76 : vector<2x32xf32>
    %95 = arith.mulf %90, %92 : vector<2x32xf32>
    %96 = arith.addf %94, %95 : vector<2x32xf32>
    %97 = math.tanh %96 : vector<2x32xf32>
    %98 = arith.mulf %93, %97 : vector<2x32xf32>
    %99 = vector.extract_strided_slice %11 {offsets = [4, 0], sizes = [1, 128], strides = [1, 1]} : vector<8x128xf32> to vector<1x128xf32>
    %100 = vector.extract_strided_slice %16 {offsets = [4, 0], sizes = [1, 128], strides = [1, 1]} : vector<8x128xf32> to vector<1x128xf32>
    %101 = tpu.concatenate %99, %100 in 0 : vector<1x128xf32>, vector<1x128xf32> -> vector<2x128xf32>
    %cst_23 = arith.constant dense<0.000000e+00> : vector<2x128xf32>
    %102 = tpu.matmul %98, %1, %cst_23 {dimension_numbers = #tpu.dot_dimension_numbers<[1], [0], [0], [1], [0, 0, 1, 1], [], []>} : vector<2x32xf32>, vector<32x128xf32>, vector<2x128xf32> -> vector<2x128xf32>
    %103 = arith.addf %101, %102 : vector<2x128xf32>
    %104 = arith.negf %103 : vector<2x128xf32>
    %105 = math.exp %104 : vector<2x128xf32>
    %cst_24 = arith.constant 1.000000e+00 : f32
    %106 = vector.broadcast %cst_24 : f32 to vector<2x128xf32>
    %107 = arith.addf %106, %105 : vector<2x128xf32>
    %108 = arith.divf %106, %107 : vector<2x128xf32>
    %109 = math.tanh %103 : vector<2x128xf32>
    %110 = vector.extract_strided_slice %108 {offsets = [0, 0], sizes = [2, 32], strides = [1, 1]} : vector<2x128xf32> to vector<2x32xf32>
    %111 = vector.extract_strided_slice %108 {offsets = [0, 32], sizes = [2, 32], strides = [1, 1]} : vector<2x128xf32> to vector<2x32xf32>
    %112 = vector.extract_strided_slice %109 {offsets = [0, 64], sizes = [2, 32], strides = [1, 1]} : vector<2x128xf32> to vector<2x32xf32>
    %113 = vector.extract_strided_slice %108 {offsets = [0, 96], sizes = [2, 32], strides = [1, 1]} : vector<2x128xf32> to vector<2x32xf32>
    %114 = arith.mulf %111, %96 : vector<2x32xf32>
    %115 = arith.mulf %110, %112 : vector<2x32xf32>
    %116 = arith.addf %114, %115 : vector<2x32xf32>
    %117 = math.tanh %116 : vector<2x32xf32>
    %118 = arith.mulf %113, %117 : vector<2x32xf32>
    %119 = vector.extract_strided_slice %11 {offsets = [5, 0], sizes = [1, 128], strides = [1, 1]} : vector<8x128xf32> to vector<1x128xf32>
    %120 = vector.extract_strided_slice %16 {offsets = [5, 0], sizes = [1, 128], strides = [1, 1]} : vector<8x128xf32> to vector<1x128xf32>
    %121 = tpu.concatenate %119, %120 in 0 : vector<1x128xf32>, vector<1x128xf32> -> vector<2x128xf32>
    %cst_25 = arith.constant dense<0.000000e+00> : vector<2x128xf32>
    %122 = tpu.matmul %118, %1, %cst_25 {dimension_numbers = #tpu.dot_dimension_numbers<[1], [0], [0], [1], [0, 0, 1, 1], [], []>} : vector<2x32xf32>, vector<32x128xf32>, vector<2x128xf32> -> vector<2x128xf32>
    %123 = arith.addf %121, %122 : vector<2x128xf32>
    %124 = arith.negf %123 : vector<2x128xf32>
    %125 = math.exp %124 : vector<2x128xf32>
    %cst_26 = arith.constant 1.000000e+00 : f32
    %126 = vector.broadcast %cst_26 : f32 to vector<2x128xf32>
    %127 = arith.addf %126, %125 : vector<2x128xf32>
    %128 = arith.divf %126, %127 : vector<2x128xf32>
    %129 = math.tanh %123 : vector<2x128xf32>
    %130 = vector.extract_strided_slice %128 {offsets = [0, 0], sizes = [2, 32], strides = [1, 1]} : vector<2x128xf32> to vector<2x32xf32>
    %131 = vector.extract_strided_slice %128 {offsets = [0, 32], sizes = [2, 32], strides = [1, 1]} : vector<2x128xf32> to vector<2x32xf32>
    %132 = vector.extract_strided_slice %129 {offsets = [0, 64], sizes = [2, 32], strides = [1, 1]} : vector<2x128xf32> to vector<2x32xf32>
    %133 = vector.extract_strided_slice %128 {offsets = [0, 96], sizes = [2, 32], strides = [1, 1]} : vector<2x128xf32> to vector<2x32xf32>
    %134 = arith.mulf %131, %116 : vector<2x32xf32>
    %135 = arith.mulf %130, %132 : vector<2x32xf32>
    %136 = arith.addf %134, %135 : vector<2x32xf32>
    %137 = math.tanh %136 : vector<2x32xf32>
    %138 = arith.mulf %133, %137 : vector<2x32xf32>
    %139 = vector.extract_strided_slice %11 {offsets = [6, 0], sizes = [1, 128], strides = [1, 1]} : vector<8x128xf32> to vector<1x128xf32>
    %140 = vector.extract_strided_slice %16 {offsets = [6, 0], sizes = [1, 128], strides = [1, 1]} : vector<8x128xf32> to vector<1x128xf32>
    %141 = tpu.concatenate %139, %140 in 0 : vector<1x128xf32>, vector<1x128xf32> -> vector<2x128xf32>
    %cst_27 = arith.constant dense<0.000000e+00> : vector<2x128xf32>
    %142 = tpu.matmul %138, %1, %cst_27 {dimension_numbers = #tpu.dot_dimension_numbers<[1], [0], [0], [1], [0, 0, 1, 1], [], []>} : vector<2x32xf32>, vector<32x128xf32>, vector<2x128xf32> -> vector<2x128xf32>
    %143 = arith.addf %141, %142 : vector<2x128xf32>
    %144 = arith.negf %143 : vector<2x128xf32>
    %145 = math.exp %144 : vector<2x128xf32>
    %cst_28 = arith.constant 1.000000e+00 : f32
    %146 = vector.broadcast %cst_28 : f32 to vector<2x128xf32>
    %147 = arith.addf %146, %145 : vector<2x128xf32>
    %148 = arith.divf %146, %147 : vector<2x128xf32>
    %149 = math.tanh %143 : vector<2x128xf32>
    %150 = vector.extract_strided_slice %148 {offsets = [0, 0], sizes = [2, 32], strides = [1, 1]} : vector<2x128xf32> to vector<2x32xf32>
    %151 = vector.extract_strided_slice %148 {offsets = [0, 32], sizes = [2, 32], strides = [1, 1]} : vector<2x128xf32> to vector<2x32xf32>
    %152 = vector.extract_strided_slice %149 {offsets = [0, 64], sizes = [2, 32], strides = [1, 1]} : vector<2x128xf32> to vector<2x32xf32>
    %153 = vector.extract_strided_slice %148 {offsets = [0, 96], sizes = [2, 32], strides = [1, 1]} : vector<2x128xf32> to vector<2x32xf32>
    %154 = arith.mulf %151, %136 : vector<2x32xf32>
    %155 = arith.mulf %150, %152 : vector<2x32xf32>
    %156 = arith.addf %154, %155 : vector<2x32xf32>
    %157 = math.tanh %156 : vector<2x32xf32>
    %158 = arith.mulf %153, %157 : vector<2x32xf32>
    %159 = vector.extract_strided_slice %11 {offsets = [7, 0], sizes = [1, 128], strides = [1, 1]} : vector<8x128xf32> to vector<1x128xf32>
    %160 = vector.extract_strided_slice %16 {offsets = [7, 0], sizes = [1, 128], strides = [1, 1]} : vector<8x128xf32> to vector<1x128xf32>
    %161 = tpu.concatenate %159, %160 in 0 : vector<1x128xf32>, vector<1x128xf32> -> vector<2x128xf32>
    %cst_29 = arith.constant dense<0.000000e+00> : vector<2x128xf32>
    %162 = tpu.matmul %158, %1, %cst_29 {dimension_numbers = #tpu.dot_dimension_numbers<[1], [0], [0], [1], [0, 0, 1, 1], [], []>} : vector<2x32xf32>, vector<32x128xf32>, vector<2x128xf32> -> vector<2x128xf32>
    %163 = arith.addf %161, %162 : vector<2x128xf32>
    %164 = arith.negf %163 : vector<2x128xf32>
    %165 = math.exp %164 : vector<2x128xf32>
    %cst_30 = arith.constant 1.000000e+00 : f32
    %166 = vector.broadcast %cst_30 : f32 to vector<2x128xf32>
    %167 = arith.addf %166, %165 : vector<2x128xf32>
    %168 = arith.divf %166, %167 : vector<2x128xf32>
    %169 = math.tanh %163 : vector<2x128xf32>
    %170 = vector.extract_strided_slice %168 {offsets = [0, 0], sizes = [2, 32], strides = [1, 1]} : vector<2x128xf32> to vector<2x32xf32>
    %171 = vector.extract_strided_slice %168 {offsets = [0, 32], sizes = [2, 32], strides = [1, 1]} : vector<2x128xf32> to vector<2x32xf32>
    %172 = vector.extract_strided_slice %169 {offsets = [0, 64], sizes = [2, 32], strides = [1, 1]} : vector<2x128xf32> to vector<2x32xf32>
    %173 = vector.extract_strided_slice %168 {offsets = [0, 96], sizes = [2, 32], strides = [1, 1]} : vector<2x128xf32> to vector<2x32xf32>
    %174 = arith.mulf %171, %156 : vector<2x32xf32>
    %175 = arith.mulf %170, %172 : vector<2x32xf32>
    %176 = arith.addf %174, %175 : vector<2x32xf32>
    %177 = math.tanh %176 : vector<2x32xf32>
    %178 = arith.mulf %173, %177 : vector<2x32xf32>
    %cst_31 = arith.constant 0.000000e+00 : f32
    %179 = vector.broadcast %cst_31 : f32 to vector<2x32xf32>
    %180 = arith.maximumf %178, %179 : vector<2x32xf32>
    %cst_32 = arith.constant dense<0.000000e+00> : vector<2x128xf32>
    %181 = tpu.matmul %180, %2, %cst_32 {dimension_numbers = #tpu.dot_dimension_numbers<[1], [0], [0], [1], [0, 0, 1, 1], [], []>} : vector<2x32xf32>, vector<32x128xf32>, vector<2x128xf32> -> vector<2x128xf32>
    %182 = vector.broadcast %4 : vector<1x128xf32> to vector<2x128xf32>
    %183 = arith.addf %181, %182 : vector<2x128xf32>
    %cst_33 = arith.constant 0.000000e+00 : f32
    %184 = vector.broadcast %cst_33 : f32 to vector<2x128xf32>
    %185 = arith.maximumf %183, %184 : vector<2x128xf32>
    %186 = vector.broadcast %5 : vector<1x128xf32> to vector<2x128xf32>
    %187 = arith.mulf %185, %186 : vector<2x128xf32>
    %cst_34 = arith.constant dense<0.000000e+00> : vector<2xf32>
    %188 = vector.multi_reduction <add>, %187, %cst_34 [1] : vector<2x128xf32> to vector<2xf32>
    %189 = vector.shape_cast %188 : vector<2xf32> to vector<2x1xf32>
    %190 = vector.broadcast %6 : vector<1x1xf32> to vector<2x1xf32>
    %191 = arith.addf %189, %190 : vector<2x1xf32>
    %c0_35 = arith.constant 0 : index
    %c0_36 = arith.constant 0 : index
    %192 = vector.load %arg2[%c0_35, %c0_36] : memref<2x1xf32, #tpu.memory_space<vmem>>, vector<2x1xf32>
    tpu.vector_store %arg2[%c0_35, %c0_36], %191 {strides = array<i32>} : memref<2x1xf32, #tpu.memory_space<vmem>>, vector<2x1xf32>,
    return
  }
}

</mosaic_0001>

<bundles_post_ra>
// kernel: tpu_custom_call.1
= control target key start
LH: loop header
LB: loop body
LE: loop exit
PB: predicated region body
PF: predicated region fallthrough
CT: control target
= control target key end

     0   :  { %7 = vsyncpa [#allocation3], 0  ;;  %s1469_s9 = smov [#allocation2]   ;;  %s1644_s0 = inlined_call_operand.vmem [shape: f32[2,8,4], index: 0, kind: input, shape index: {}]   ;;  %s1645_s1 = inlined_call_operand.hbm [shape: f32[80,128], index: 1, kind: input, shape index: {}]   ;;  %s1646_s2 = inlined_call_operand.vmem [shape: f32[2,1], index: 2, kind: output, shape index: {}]  }
   0x1   :  { %s15_s10 = sshll.u32 %s1469_s9, 4  ;;  %s1445_s13 = scalar_lea.hbm %s1645_s1, 1280  ;;  %s16_s10 = int_to_ptr.vmem [resolvable:$true] %s15_s10 }
   0x2   :  { %p1446_p0 = scmp.ne.s32.totalorder %s1645_s1, %s1445_s13  ;;  %p1449_p1 = scmp.lt.u32.totalorder %s1445_s13, %s1645_s1 }
   0x4   :  { %p1451_p2 = pnand %p1449_p1, %p1446_p0 }
   0x6   :  { %1454 = shalt.err (!%p1451_p2)
}
   0x7   :  { %s1455_s18 = scalar_lea.vmem %s16_s10, 1280  ;;  %p1460_p4 = scmp.lt.s32.totalorder %s16_s10, %s16_s10 }
   0x8   :  { %p1456_p3 = scmp.ne.s32.totalorder %s16_s10, %s1455_s18  ;;  %p1461_p5 = scmp.lt.s32.totalorder %s1455_s18, %s1455_s18 }
   0xa   :  { %p1462_p6 = por %p1461_p5, %p1460_p4 }
   0xc   :  { %p1463_p7 = pnand %p1462_p6, %p1456_p3 }
   0xe   :  { %1466 = shalt.err (!%p1463_p7)
}
   0xf   :  { %s1470_s19 = smov 128   ;;  %s1471_s20 = smov 8  }
  0x10   :  { %21 = dma.hbm_to_vmem [thread:$0]  %s1645_s1, 1280, %s16_s10, [#allocation3], %s1470_s19, %s1470_s19, %s1471_s20  }
  0x11   :  { %1467 = dma.done.wait [#allocation3], 1280  }
  0x12   :  { %1468 = vsyncadd [#allocation3], 4294966016  ;;  %v1472_v0 = vmov 0.0   ;;  %vm1473_vm0 = vmmov 0   ;;  %v1474_v1 = vmov 0.0|0.0   ;;  %vm47_vm1 = vcmask 1043456  }
  0x13   :  { %1210 = vmatprep.subr.mxu1 %v1472_v0  ;;  %1212 = vmatprep.mubr.msk.f32.mxu1 %vm1473_vm0, %v1472_v0  ;;  %vm43_vm2 = vcmask 31744   ;;  %v25_v2 = vld [vmem:[#allocation2] sm:$0xf]  ;;  %v26_v4 = vld [vmem:[#allocation2 + $0x8] sm:$0xff]  ;;  %v27_v5 = vld [vmem:[#allocation2 + $0x10] sm:$0xff]  ;;  %vm199_vm3 = vcmask 1040384  }
  0x14   :  { %1319 = vmatprep.subr.bf16.mxu0 %v1474_v1  ;;  %1228 = vmatprep.mubr.msk.f32.mxu0 %vm1473_vm0, %v1472_v0  ;;  %v38_v3 = vld [vmem:[%s1644_s0] sm:$0xff]  ;;  %v28_v6 = vld [vmem:[#allocation2 + $0x18] sm:$0xff]  ;;  %v1515_v7 = vpack.c.bf16 %v27_v5, %v26_v4  ;;  %v1139_v9 = vld [vmem:[%s1644_s0 + $0x8] sm:$0xff]  ;;  %s1475_s0 = smov 64   ;;  %s1476_s26 = smov 32   ;;  %vm201_vm4 = vcmask 261120  }
  0x15   :  { %1211 = vmatpush3.msk.msra.mxu1 %vm47_vm1, %v25_v2  ;;  %v29_v8 = vld [vmem:[#allocation2 + $0x20] sm:$0xff]  ;;  %v1136_v11 = vld [vmem:[#allocation2 + $0x48] ss:$0 sm:$0xff]  ;;  %vm1120_vm5 = vcmask 1041408   ;;  %vm1129_vm6 = vcmask 1024  }
  0x16   :  { %1213 = vmatmul.mubr.msk.f32.vlgmr.msra.gmra.mrb[0].mxu1 %vm43_vm2, %v38_v3  ;;  %1215 = vmatprep.subr.mxu1 %v1472_v0  ;;  %v1523_v10 = vpack.c.bf16 %v29_v8, %v28_v6 }
  0x17   :  { %1216 = vmatpush3.msk.msra.mxu1 %vm47_vm1, %v25_v2  ;;  %1217 = vmatprep.mubr.msk.f32.mxu1 %vm1473_vm0, %v1472_v0 }
  0x18   :  { %1321 = vmatpush3.bf16.msra.mxu0 %v1515_v7  ;;  %1325 = vmatprep.subr.bf16.mxu1 %v1474_v1 }
  0x19   :  { %1322 = vmatprep.subr.bf16.mxu0 %v1474_v1 }
  0x1a   :  { %1218 = vmatmul.mubr.msk.f32.vlgmr.msra.gmra.mrb[2].mxu1 %vm43_vm2, %v1139_v9 }
  0x1b   :  { %1327 = vmatpush3.bf16.msra.mxu1 %v1515_v7  ;;  %1239 = vmatprep.mubr.msk.f32.mxu1 %vm1473_vm0, %v1472_v0 }
  0x1c   :  { %1324 = vmatpush3.bf16.msra.mxu0 %v1523_v10  ;;  %1328 = vmatprep.subr.bf16.mxu1 %v1474_v1 }
  0x1d   :  { %1331 = vmatprep.subr.bf16.mxu0 %v1474_v1 }
  0x1f   :  { %1229 = vmatmul.mubr.f32.vlgmr.msra.gmra.mrb[0].mxu0 %v1472_v0  ;;  %1330 = vmatpush3.bf16.msra.mxu1 %v1523_v10 }
  0x20   :  { %1333 = vmatpush3.bf16.msra.mxu0 %v1515_v7  ;;  %1250 = vmatprep.mubr.msk.f32.mxu0 %vm1473_vm0, %v1472_v0 }
  0x21   :  { %1334 = vmatprep.subr.bf16.mxu0 %v1474_v1  ;;  %1337 = vmatprep.subr.bf16.mxu1 %v1474_v1 }
  0x24   :  { %1336 = vmatpush3.bf16.msra.mxu0 %v1523_v10 }
  0x25   :  { %1343 = vmatprep.subr.bf16.mxu0 %v1474_v1 }
  0xe9   :  { %v117_v12 = vpop.f32.mrb[0].mxu1 }
  0xea   :  { %v118_v13 = vadd.f32 %v1136_v11, %v117_v12  ;;  %v1214_v14 = vpop.f32.mrb[1].mxu1 }
  0xec   :  { %v301_v18 = vrot.slane %v118_v13, 1  ;;  %v404_v19 = vrot.slane %v118_v13, 2  ;;  %v509_v20 = vrot.slane %v118_v13, 3  ;;  %v614_v21 = vrot.slane %v118_v13, 4 }
  0xed   :  { %v192_v15 = vpop.f32.mrb[2].mxu1  ;;  %v719_v22 = vrot.slane %v118_v13, 5  ;;  %v824_v23 = vrot.slane %v118_v13, 6  ;;  %v929_v36 = vrot.slane %v118_v13, 7 }
  0xee   :  { %v193_v16 = vadd.f32 %v1136_v11, %v192_v15  ;;  %v1219_v17 = vpop.f32.mrb[3].mxu1 }
  0xf0   :  { %v197_v24 = vrot.slane %v193_v16, 7  ;;  %v303_v25 = vsel %vm199_vm3, %v301_v18, %v193_v16  ;;  %v406_v26 = vrot.slane %v193_v16, 1  ;;  %v511_v27 = vrot.slane %v193_v16, 2 }
  0xf1   :  { %v616_v28 = vrot.slane %v193_v16, 3  ;;  %v721_v29 = vrot.slane %v193_v16, 4  ;;  %v826_v30 = vrot.slane %v193_v16, 5  ;;  %v931_v31 = vrot.slane %v193_v16, 6 }
  0xf2   :  { %v200_v32 = vsel %vm199_vm3, %v118_v13, %v197_v24  ;;  %v271_v33 = vpop.f32.mrb[0].mxu0  ;;  %v1546_v34 = vsel %vm199_vm3, %v404_v19, %v406_v26  ;;  %v1549_v35 = vsel %vm199_vm3, %v509_v20, %v511_v27 }
  0xf3   :  { %v275_v37 = vadd.f32 %v271_v33, %v200_v32  ;;  %v1230_v38 = vpop.f32.mrb[1].mxu0  ;;  %v1552_v39 = vsel %vm199_vm3, %v614_v21, %v616_v28  ;;  %v1555_v40 = vsel %vm199_vm3, %v719_v22, %v721_v29  ;;  %v1558_v41 = vsel %vm199_vm3, %v824_v23, %v826_v30 }
  0xf4   :  { %v1561_v42 = vsel %vm199_vm3, %v929_v36, %v931_v31 }
  0xf5   :  { %1381 = vtanh.f32 %v275_v37  ;;  %v1142_v44 = vmul.f32 -1.442695, %v275_v37 }
  0xf7   :  { %1383 = vpow2.f32 %v1142_v44 }
  0xff   :  { %v1382_v43 = vpop.eup %1381 }
 0x100   :  { %285 = vrot.lane.b32.xlu0 %v1382_v43, %s1475_s0 }
 0x101   :  { %v1384_v45 = vpop.eup %1383 }
 0x102   :  { %v279_v46 = vadd.f32 1.0, %v1384_v45 }
 0x104   :  { %1385 = vrcp.f32 %v279_v46 }
 0x10e   :  { %v1386_v47 = vpop.eup %1385 }
 0x10f   :  { %v283_v50 = vmul.f32 0.0, %v1386_v47 }
 0x172   :  { %v286_v48 = vpop.permute.xlu0 %285 }
 0x173   :  { %v288_v49 = vmul.f32 %v1386_v47, %v286_v48 }
 0x175   :  { %290 = vrot.lane.b32.xlu0 %v288_v49, %s1476_s26 }
 0x1e7   :  { %v291_v51 = vpop.permute.xlu0 %290 }
 0x1e8   :  { %v293_v52 = vadd.f32 %v291_v51, %v283_v50 }
 0x1ea   :  { %1387 = vtanh.f32 %v293_v52 }
 0x1f4   :  { %v1388_v53 = vpop.eup %1387 }
 0x1f5   :  { %296 = vrot.lane.b32.xlu1 %v1388_v53, %s1475_s0 }
 0x267   :  { %v297_v54 = vpop.permute.xlu1 %296 }
 0x268   :  { %v299_v55 = vmul.f32 %v1386_v47, %v297_v54 }
 0x26a   :  { %305 = vrot.lane.b32.xlu1 %v299_v55, %s1476_s26 }
 0x2dc   :  { %v306_v56 = vpop.permute.xlu1 %305 }
 0x2dd   :  { %1240 = vmatmul.mubr.msk.f32.vlgmr.msra.gmra.mrb[4].mxu1 %vm201_vm4, %v306_v56 }
 0x2de   :  { %1339 = vmatpush3.bf16.msra.mxu1 %v1515_v7  ;;  %1261 = vmatprep.mubr.msk.f32.mxu1 %vm1473_vm0, %v1472_v0 }
 0x2df   :  { %1340 = vmatprep.subr.bf16.mxu1 %v1474_v1 }
 0x2e2   :  { %1342 = vmatpush3.bf16.msra.mxu1 %v1523_v10 }
 0x2e3   :  { %1349 = vmatprep.subr.bf16.mxu1 %v1474_v1 }
 0x3b0   :  { %v375_v57 = vpop.f32.mrb[4].mxu1 }
 0x3b1   :  { %v379_v58 = vadd.f32 %v375_v57, %v303_v25  ;;  %v1241_v59 = vpop.f32.mrb[5].mxu1 }
 0x3b3   :  { %1389 = vtanh.f32 %v379_v58  ;;  %v1144_v61 = vmul.f32 -1.442695, %v379_v58 }
 0x3b5   :  { %1391 = vpow2.f32 %v1144_v61 }
 0x3bd   :  { %v1390_v60 = vpop.eup %1389 }
 0x3be   :  { %389 = vrot.lane.b32.xlu0 %v1390_v60, %s1475_s0 }
 0x3bf   :  { %v1392_v62 = vpop.eup %1391 }
 0x3c0   :  { %v383_v63 = vadd.f32 1.0, %v1392_v62 }
 0x3c2   :  { %1393 = vrcp.f32 %v383_v63 }
 0x3cc   :  { %v1394_v2 = vpop.eup %1393 }
 0x3cd   :  { %v387_v5 = vmul.f32 %v1394_v2, %v293_v52 }
 0x430   :  { %v390_v3 = vpop.permute.xlu0 %389 }
 0x431   :  { %v392_v4 = vmul.f32 %v1394_v2, %v390_v3 }
 0x433   :  { %394 = vrot.lane.b32.xlu1 %v392_v4, %s1476_s26 }
 0x4a5   :  { %v395_v6 = vpop.permute.xlu1 %394 }
 0x4a6   :  { %v397_v8 = vadd.f32 %v395_v6, %v387_v5 }
 0x4a8   :  { %1395 = vtanh.f32 %v397_v8 }
 0x4b2   :  { %v1396_v9 = vpop.eup %1395 }
 0x4b3   :  { %400 = vrot.lane.b32.xlu0 %v1396_v9, %s1475_s0 }
 0x525   :  { %v401_v11 = vpop.permute.xlu0 %400 }
 0x526   :  { %v403_v12 = vmul.f32 %v1394_v2, %v401_v11 }
 0x528   :  { %410 = vrot.lane.b32.xlu1 %v403_v12, %s1476_s26 }
 0x59a   :  { %v411_v13 = vpop.permute.xlu1 %410 }
 0x59b   :  { %1251 = vmatmul.mubr.msk.f32.vlgmr.msra.gmra.mrb[2].mxu0 %vm201_vm4, %v411_v13 }
 0x59c   :  { %1345 = vmatpush3.bf16.msra.mxu0 %v1515_v7  ;;  %1272 = vmatprep.mubr.msk.f32.mxu0 %vm1473_vm0, %v1472_v0 }
 0x59d   :  { %1346 = vmatprep.subr.bf16.mxu0 %v1474_v1 }
 0x5a0   :  { %1348 = vmatpush3.bf16.msra.mxu0 %v1523_v10 }
 0x5a1   :  { %1355 = vmatprep.subr.bf16.mxu0 %v1474_v1 }
 0x66e   :  { %v480_v14 = vpop.f32.mrb[2].mxu0 }
 0x66f   :  { %v484_v15 = vadd.f32 %v480_v14, %v1546_v34  ;;  %v1252_v16 = vpop.f32.mrb[3].mxu0 }
 0x671   :  { %1397 = vtanh.f32 %v484_v15  ;;  %v1146_v18 = vmul.f32 -1.442695, %v484_v15 }
 0x673   :  { %1399 = vpow2.f32 %v1146_v18 }
 0x67b   :  { %v1398_v17 = vpop.eup %1397 }
 0x67c   :  { %494 = vrot.lane.b32.xlu0 %v1398_v17, %s1475_s0 }
 0x67d   :  { %v1400_v19 = vpop.eup %1399 }
 0x67e   :  { %v488_v20 = vadd.f32 1.0, %v1400_v19 }
 0x680   :  { %1401 = vrcp.f32 %v488_v20 }
 0x68a   :  { %v1402_v21 = vpop.eup %1401 }
 0x68b   :  { %v492_v24 = vmul.f32 %v1402_v21, %v397_v8 }
 0x6ee   :  { %v495_v22 = vpop.permute.xlu0 %494 }
 0x6ef   :  { %v497_v23 = vmul.f32 %v1402_v21, %v495_v22 }
 0x6f1   :  { %499 = vrot.lane.b32.xlu1 %v497_v23, %s1476_s26 }
 0x763   :  { %v500_v25 = vpop.permute.xlu1 %499 }
 0x764   :  { %v502_v26 = vadd.f32 %v500_v25, %v492_v24 }
 0x766   :  { %1403 = vtanh.f32 %v502_v26 }
 0x770   :  { %v1404_v27 = vpop.eup %1403 }
 0x771   :  { %505 = vrot.lane.b32.xlu0 %v1404_v27, %s1475_s0 }
 0x7e3   :  { %v506_v28 = vpop.permute.xlu0 %505 }
 0x7e4   :  { %v508_v29 = vmul.f32 %v1402_v21, %v506_v28 }
 0x7e6   :  { %515 = vrot.lane.b32.xlu1 %v508_v29, %s1476_s26 }
 0x858   :  { %v516_v30 = vpop.permute.xlu1 %515 }
 0x859   :  { %1262 = vmatmul.mubr.msk.f32.vlgmr.msra.gmra.mrb[6].mxu1 %vm201_vm4, %v516_v30 }
 0x85a   :  { %1351 = vmatpush3.bf16.msra.mxu1 %v1515_v7  ;;  %1283 = vmatprep.mubr.msk.f32.mxu1 %vm1473_vm0, %v1472_v0 }
 0x85b   :  { %1352 = vmatprep.subr.bf16.mxu1 %v1474_v1 }
 0x85e   :  { %1354 = vmatpush3.bf16.msra.mxu1 %v1523_v10 }
 0x85f   :  { %1361 = vmatprep.subr.bf16.mxu1 %v1474_v1 }
 0x92c   :  { %v585_v31 = vpop.f32.mrb[6].mxu1 }
 0x92d   :  { %v589_v32 = vadd.f32 %v585_v31, %v1549_v35  ;;  %v1263_v33 = vpop.f32.mrb[7].mxu1 }
 0x92f   :  { %1405 = vtanh.f32 %v589_v32  ;;  %v1148_v36 = vmul.f32 -1.442695, %v589_v32 }
 0x931   :  { %1407 = vpow2.f32 %v1148_v36 }
 0x939   :  { %v1406_v34 = vpop.eup %1405 }
 0x93a   :  { %599 = vrot.lane.b32.xlu0 %v1406_v34, %s1475_s0 }
 0x93b   :  { %v1408_v37 = vpop.eup %1407 }
 0x93c   :  { %v593_v38 = vadd.f32 1.0, %v1408_v37 }
 0x93e   :  { %1409 = vrcp.f32 %v593_v38 }
 0x948   :  { %v1410_v43 = vpop.eup %1409 }
 0x949   :  { %v597_v46 = vmul.f32 %v1410_v43, %v502_v26 }
 0x9ac   :  { %v600_v44 = vpop.permute.xlu0 %599 }
 0x9ad   :  { %v602_v45 = vmul.f32 %v1410_v43, %v600_v44 }
 0x9af   :  { %604 = vrot.lane.b32.xlu1 %v602_v45, %s1476_s26 }
 0xa21   :  { %v605_v47 = vpop.permute.xlu1 %604 }
 0xa22   :  { %v607_v48 = vadd.f32 %v605_v47, %v597_v46 }
 0xa24   :  { %1411 = vtanh.f32 %v607_v48 }
 0xa2e   :  { %v1412_v35 = vpop.eup %1411 }
 0xa2f   :  { %610 = vrot.lane.b32.xlu0 %v1412_v35, %s1475_s0 }
 0xaa1   :  { %v611_v49 = vpop.permute.xlu0 %610 }
 0xaa2   :  { %v613_v50 = vmul.f32 %v1410_v43, %v611_v49 }
 0xaa4   :  { %620 = vrot.lane.b32.xlu1 %v613_v50, %s1476_s26 }
 0xb16   :  { %v621_v51 = vpop.permute.xlu1 %620 }
 0xb17   :  { %1273 = vmatmul.mubr.msk.f32.vlgmr.msra.gmra.mrb[4].mxu0 %vm201_vm4, %v621_v51 }
 0xb18   :  { %1357 = vmatpush3.bf16.msra.mxu0 %v1515_v7  ;;  %1294 = vmatprep.mubr.msk.f32.mxu0 %vm1473_vm0, %v1472_v0 }
 0xb19   :  { %1358 = vmatprep.subr.bf16.mxu0 %v1474_v1 }
 0xb1c   :  { %1360 = vmatpush3.bf16.msra.mxu0 %v1523_v10 }
 0xb1d   :  { %1367 = vmatprep.subr.bf16.mxu0 %v1474_v1 }
 0xbea   :  { %v690_v52 = vpop.f32.mrb[4].mxu0 }
 0xbeb   :  { %v694_v53 = vadd.f32 %v690_v52, %v1552_v39  ;;  %v1274_v54 = vpop.f32.mrb[5].mxu0 }
 0xbec   :  { %v31_v54 = vld [vmem:[#allocation2 + $0x30] sm:$0xff] }
 0xbed   :  { %1413 = vtanh.f32 %v694_v53  ;;  %v1150_v56 = vmul.f32 -1.442695, %v694_v53 }
 0xbef   :  { %1415 = vpow2.f32 %v1150_v56 }
 0xbf7   :  { %v1414_v55 = vpop.eup %1413 }
 0xbf8   :  { %704 = vrot.lane.b32.xlu0 %v1414_v55, %s1475_s0  ;;  %v32_v55 = vld [vmem:[#allocation2 + $0x38] sm:$0xff] }
 0xbf9   :  { %v1416_v57 = vpop.eup %1415 }
 0xbfa   :  { %v698_v58 = vadd.f32 1.0, %v1416_v57  ;;  %v33_v57 = vld [vmem:[#allocation2 + $0x40] sm:$0xff] }
 0xbfc   :  { %1417 = vrcp.f32 %v698_v58  ;;  %v1371_v58 = vpack.c.bf16 %v33_v57, %v32_v55 }
 0xc06   :  { %v1418_v59 = vpop.eup %1417 }
 0xc07   :  { %v702_v62 = vmul.f32 %v1418_v59, %v607_v48 }
 0xc6a   :  { %v705_v60 = vpop.permute.xlu0 %704 }
 0xc6b   :  { %v707_v61 = vmul.f32 %v1418_v59, %v705_v60 }
 0xc6d   :  { %709 = vrot.lane.b32.xlu1 %v707_v61, %s1476_s26 }
 0xcdf   :  { %v710_v63 = vpop.permute.xlu1 %709 }
 0xce0   :  { %v712_v2 = vadd.f32 %v710_v63, %v702_v62 }
 0xce2   :  { %1419 = vtanh.f32 %v712_v2 }
 0xcec   :  { %v1420_v39 = vpop.eup %1419 }
 0xced   :  { %715 = vrot.lane.b32.xlu0 %v1420_v39, %s1475_s0 }
 0xd5f   :  { %v716_v3 = vpop.permute.xlu0 %715 }
 0xd60   :  { %v718_v4 = vmul.f32 %v1418_v59, %v716_v3 }
 0xd62   :  { %725 = vrot.lane.b32.xlu1 %v718_v4, %s1476_s26 }
 0xdd4   :  { %v726_v5 = vpop.permute.xlu1 %725 }
 0xdd5   :  { %1284 = vmatmul.mubr.msk.f32.vlgmr.msra.gmra.mrb[8].mxu1 %vm201_vm4, %v726_v5  ;;  %v1159_v5 = vld [vmem:[#allocation2 + $0x4a] ss:$0 sm:$0xff] }
 0xdd6   :  { %1363 = vmatpush3.bf16.msra.mxu1 %v1515_v7  ;;  %1305 = vmatprep.mubr.msk.f32.mxu1 %vm1473_vm0, %v1472_v0 }
 0xdd7   :  { %1364 = vmatprep.subr.bf16.mxu1 %v1474_v1 }
 0xdda   :  { %1366 = vmatpush3.bf16.msra.mxu1 %v1523_v10 }
 0xea8   :  { %v795_v6 = vpop.f32.mrb[8].mxu1 }
 0xea9   :  { %v799_v8 = vadd.f32 %v795_v6, %v1555_v40  ;;  %v1285_v9 = vpop.f32.mrb[9].mxu1 }
 0xeaa   :  { %v1160_v9 = vld [vmem:[#allocation2 + $0x4b] ss:$0 sm:$0xff] }
 0xeab   :  { %1421 = vtanh.f32 %v799_v8  ;;  %v1152_v12 = vmul.f32 -1.442695, %v799_v8 }
 0xead   :  { %1423 = vpow2.f32 %v1152_v12 }
 0xeb5   :  { %v1422_v11 = vpop.eup %1421 }
 0xeb6   :  { %809 = vrot.lane.b32.xlu0 %v1422_v11, %s1475_s0 }
 0xeb7   :  { %v1424_v13 = vpop.eup %1423 }
 0xeb8   :  { %v803_v14 = vadd.f32 1.0, %v1424_v13 }
 0xeba   :  { %1425 = vrcp.f32 %v803_v14 }
 0xec4   :  { %v1426_v7 = vpop.eup %1425 }
 0xec5   :  { %v807_v17 = vmul.f32 %v1426_v7, %v712_v2  ;;  %v1157_v2 = vld [vmem:[#allocation2 + $0x49] ss:$0 sm:$0xff] }
 0xf28   :  { %v810_v15 = vpop.permute.xlu0 %809 }
 0xf29   :  { %v812_v16 = vmul.f32 %v1426_v7, %v810_v15 }
 0xf2b   :  { %814 = vrot.lane.b32.xlu1 %v812_v16, %s1476_s26 }
 0xf9d   :  { %v815_v10 = vpop.permute.xlu1 %814 }
 0xf9e   :  { %v817_v18 = vadd.f32 %v815_v10, %v807_v17 }
 0xfa0   :  { %1427 = vtanh.f32 %v817_v18 }
 0xfaa   :  { %v1428_v40 = vpop.eup %1427 }
 0xfab   :  { %820 = vrot.lane.b32.xlu0 %v1428_v40, %s1475_s0 }
0x101d   :  { %v821_v19 = vpop.permute.xlu0 %820 }
0x101e   :  { %v823_v20 = vmul.f32 %v1426_v7, %v821_v19 }
0x1020   :  { %830 = vrot.lane.b32.xlu1 %v823_v20, %s1476_s26 }
0x1092   :  { %v831_v21 = vpop.permute.xlu1 %830 }
0x1093   :  { %1295 = vmatmul.mubr.msk.f32.vlgmr.msra.gmra.mrb[6].mxu0 %vm201_vm4, %v831_v21 }
0x1094   :  { %1316 = vmatprep.mubr.msk.f32.mxu0 %vm1473_vm0, %v1472_v0 }
0x1166   :  { %v900_v22 = vpop.f32.mrb[6].mxu0 }
0x1167   :  { %v904_v23 = vadd.f32 %v900_v22, %v1558_v41  ;;  %v1296_v24 = vpop.f32.mrb[7].mxu0 }
0x1169   :  { %1429 = vtanh.f32 %v904_v23  ;;  %v1154_v26 = vmul.f32 -1.442695, %v904_v23 }
0x116b   :  { %1431 = vpow2.f32 %v1154_v26 }
0x1173   :  { %v1430_v25 = vpop.eup %1429 }
0x1174   :  { %914 = vrot.lane.b32.xlu0 %v1430_v25, %s1475_s0 }
0x1175   :  { %v1432_v27 = vpop.eup %1431 }
0x1176   :  { %v908_v28 = vadd.f32 1.0, %v1432_v27 }
0x1178   :  { %1433 = vrcp.f32 %v908_v28 }
0x1182   :  { %v1434_v29 = vpop.eup %1433 }
0x1183   :  { %v912_v32 = vmul.f32 %v1434_v29, %v817_v18 }
0x11e6   :  { %v915_v30 = vpop.permute.xlu0 %914 }
0x11e7   :  { %v917_v31 = vmul.f32 %v1434_v29, %v915_v30 }
0x11e9   :  { %919 = vrot.lane.b32.xlu1 %v917_v31, %s1476_s26 }
0x125b   :  { %v920_v0 = vpop.permute.xlu1 %919 }
0x125c   :  { %v922_v33 = vadd.f32 %v920_v0, %v912_v32 }
0x125e   :  { %1435 = vtanh.f32 %v922_v33 }
0x1268   :  { %v1436_v41 = vpop.eup %1435 }
0x1269   :  { %925 = vrot.lane.b32.xlu0 %v1436_v41, %s1475_s0 }
0x12db   :  { %v926_v34 = vpop.permute.xlu0 %925 }
0x12dc   :  { %v928_v36 = vmul.f32 %v1434_v29, %v926_v34 }
0x12de   :  { %935 = vrot.lane.b32.xlu1 %v928_v36, %s1476_s26 }
0x1350   :  { %v936_v37 = vpop.permute.xlu1 %935 }
0x1351   :  { %1306 = vmatmul.mubr.msk.f32.vlgmr.msra.gmra.mrb[10].mxu1 %vm201_vm4, %v936_v37 }
0x1424   :  { %v1005_v38 = vpop.f32.mrb[10].mxu1 }
0x1425   :  { %v1009_v43 = vadd.f32 %v1005_v38, %v1561_v42  ;;  %v1307_v44 = vpop.f32.mrb[11].mxu1  ;;  %v30_v42 = vld [vmem:[#allocation2 + $0x28] sm:$0xff] }
0x1426   :  { %v1368_v56 = vpack.c.bf16 %v31_v54, %v30_v42 }
0x1427   :  { %1437 = vtanh.f32 %v1009_v43  ;;  %v1156_v46 = vmul.f32 -1.442695, %v1009_v43 }
0x1428   :  { %1369 = vmatpush3.bf16.msra.mxu0 %v1368_v56 }
0x1429   :  { %1439 = vpow2.f32 %v1156_v46  ;;  %1370 = vmatprep.subr.bf16.mxu0 %v1474_v1 }
0x142c   :  { %1372 = vmatpush3.bf16.msra.mxu0 %v1371_v58 }
0x1431   :  { %v1438_v45 = vpop.eup %1437 }
0x1432   :  { %1019 = vrot.lane.b32.xlu0 %v1438_v45, %s1475_s0 }
0x1433   :  { %v1440_v47 = vpop.eup %1439 }
0x1434   :  { %v1013_v48 = vadd.f32 1.0, %v1440_v47 }
0x1436   :  { %1441 = vrcp.f32 %v1013_v48 }
0x1440   :  { %v1442_v35 = vpop.eup %1441 }
0x1441   :  { %v1017_v51 = vmul.f32 %v1442_v35, %v922_v33 }
0x14a4   :  { %v1020_v49 = vpop.permute.xlu0 %1019 }
0x14a5   :  { %v1022_v50 = vmul.f32 %v1442_v35, %v1020_v49 }
0x14a7   :  { %1024 = vrot.lane.b32.xlu1 %v1022_v50, %s1476_s26 }
0x1519   :  { %v1025_v52 = vpop.permute.xlu1 %1024 }
0x151a   :  { %v1027_v53 = vadd.f32 %v1025_v52, %v1017_v51 }
0x151c   :  { %1443 = vtanh.f32 %v1027_v53 }
0x1526   :  { %v1444_v59 = vpop.eup %1443 }
0x1527   :  { %1030 = vrot.lane.b32.xlu0 %v1444_v59, %s1475_s0 }
0x1599   :  { %v1031_v60 = vpop.permute.xlu0 %1030 }
0x159a   :  { %v1033_v61 = vmul.f32 %v1442_v35, %v1031_v60 }
0x159c   :  { %v1034_v62 = vmax.f32 %v1033_v61, 0.0 }
0x159e   :  { %1040 = vrot.lane.b32.xlu1 %v1034_v62, %s1476_s26 }
0x1610   :  { %v1041_v63 = vpop.permute.xlu1 %1040 }
0x1611   :  { %1317 = vmatmul.mubr.msk.f32.vlgmr.msra.gmra.mrb[8].mxu0 %vm201_vm4, %v1041_v63 }
0x16e4   :  { %v1110_v39 = vpop.f32.mrb[8].mxu0 }
0x16e5   :  { %v1111_v3 = vadd.f32 %v1157_v2, %v1110_v39  ;;  %v1318_v4 = vpop.f32.mrb[9].mxu0 }
0x16e7   :  { %v1114_v6 = vmax.f32 %v1111_v3, 0.0 }
0x16e9   :  { %v1119_v1 = vmul.f32 %v1159_v5, %v1114_v6 }
0x16eb   :  { %v1121_v8 = vsel %vm1120_vm5, %v1119_v1, 0.0 }
0x16ec   :  { %1122 = vadd.xlane.f32.xlu0 %v1121_v8 }
0x1779   :  { %v1123_v11 = vpop.xlane.xlu0 %1122 }
0x177a   :  { %v1128_v12 = vadd.f32 %v1160_v9, %v1123_v11 }
0x177c   :  { %1130 = vst.msk [vmem:[%s1646_s2] sm:$0x3] %vm1129_vm6, %v1128_v12 }
0x177d   :  { %1135 = vsyncpa [#allocation3], 1 }

</bundles_post_ra>
